<compile_context>
chip_gen: v5e
topology: v5e:2x2
jax: 0.10.0
libtpu: 0.0.40
codegen_flags: <defaults>
</compile_context>

<pallas_src>
import functools
import math

import jax
import jax.numpy as jnp
from jax import lax
from jax.experimental import pallas as pl
from jax.experimental.pallas import tpu as pltpu

NEG_SLOPE = 0.01  # nn.LeakyReLU default negative_slope
C = 16            # channel count fixed by the module

_VMEM_CAP_BYTES = 48 << 20   # stay comfortably under v7x's 64 MiB physical VMEM


def _leaky(v):
    return jnp.where(v > 0, v, NEG_SLOPE * v)


# ---------------------------------------------------------------------------
# Pallas kernel: processes Bt batch elements packed along lanes (C, Bt*L)
# ---------------------------------------------------------------------------
def ta_block_kernel(w1m_ref, b1m_ref, w2_ref, b2_ref, w3_ref, b3_ref,
                    w4_ref, b4_ref, x_ref, out_ref, *attn_out,
                    l_per_sample, use_bf16, split_taps):
    x = x_ref[...]                                   # (C, lanes), f32 or bf16
    c, lanes = x.shape
    L = l_per_sample
    mxu_dt = jnp.bfloat16 if use_bf16 else jnp.float32

    # ---- hoisted per-sample lane position & masks (computed once, reused) ----
    iota = lax.broadcasted_iota(jnp.int32, (c, lanes), 1)
    pos = (iota & (L - 1)) if (L & (L - 1)) == 0 else (iota % L)
    m_r1 = pos < 1          # shift-right-by-1 zero region
    m_l1 = pos >= L - 1     # shift-left-by-1  zero region
    m_r2 = pos < 2          # shift-right-by-2 zero region
    m_l2 = pos >= L - 2     # shift-left-by-2  zero region
    even = (pos & 1) == 0   # maxpool lane parity

    def shift_r(v, k, mask):
        # result[:, l] = v[:, l-k] within a sample; zero where the source would
        # cross the sample start (== conv zero padding / no cross-batch leak).
        return jnp.where(mask, 0.0, pltpu.roll(v, k, axis=1))

    def shift_l(v, k, mask):
        return jnp.where(mask, 0.0, pltpu.roll(v, lanes - k, axis=1))

    def conv3(v, w_ref, b_ref, mr, ml, shift):
        # Conv1d(kernel=3, padding=1).  Cast BEFORE shift/concat so the largest
        # temporaries are already in the MXU dtype (halves their VMEM traffic
        # on the bf16 path).  Accumulation is always f32.
        vm = v if v.dtype == mxu_dt else v.astype(mxu_dt)
        left = shift_r(vm, shift, mr)
        right = shift_l(vm, shift, ml)
        w = w_ref[...].astype(mxu_dt)
        if split_taps:
            # v5e variant: three K=16 matmuls, center tap reads vm directly ->
            # no (3C, lanes) concat materialization (vector-store relief).
            ci = vm.shape[0]
            y = (jnp.dot(w[:, :ci], left, preferred_element_type=jnp.float32)
                 + jnp.dot(w[:, ci:2 * ci], vm, preferred_element_type=jnp.float32)
                 + jnp.dot(w[:, 2 * ci:], right, preferred_element_type=jnp.float32))
        else:
            vcat = jnp.concatenate([left, vm, right], axis=0)
            y = jnp.dot(w, vcat, preferred_element_type=jnp.float32)
        return y + b_ref[...]

    # conv_a_1 and conv_m consume the same shifted copies of X -> one stacked matmul
    y1m = _leaky(conv3(x, w1m_ref, b1m_ref, m_r1, m_l1, shift=1))   # (2C, lanes) f32
    x1 = y1m[:c]
    xm = y1m[c:]

    # MaxPool1d(2,2) kept at full resolution in nearest-duplicated form:
    #   d_dup[l] = max(x1[2*(l//2)], x1[2*(l//2)+1])
    d_dup = jnp.where(even,
                      jnp.maximum(x1, shift_l(x1, 1, m_l1)),
                      jnp.maximum(shift_r(x1, 1, m_r1), x1))

    # conv at half resolution followed by nearest upsample x2 == shift-by-2 conv
    # on the duplicated signal; elementwise BN+LeakyReLU commute with duplication.
    e_dup = _leaky(conv3(d_dup, w2_ref, b2_ref, m_r2, m_l2, shift=2))

    x_up = _leaky(conv3(e_dup, w3_ref, b3_ref, m_r1, m_l1, shift=1))   # conv_a_3
    x2 = x1 + x_up

    # conv_a_4 : Conv1d(16,1,1) + Sigmoid  -> VPU multiply + sublane reduce
    # (keep off the MXU unless profiling shows the extended slot is binding).
    attn = jax.nn.sigmoid(
        jnp.sum(w4_ref[...] * x2, axis=0, keepdims=True) + b4_ref[...])

    x_f32 = x.astype(jnp.float32) if use_bf16 else x
    out_ref[...] = xm * attn + x_f32
    if attn_out:
        attn_out[0][...] = attn


# ---------------------------------------------------------------------------
# Tile sizing & VMEM budgeting
# ---------------------------------------------------------------------------
def _working_set_bytes(lanes, use_bf16):
    """Rough per-step VMEM working set: double-buffered I/O + kernel temps."""
    in_b = 2 if use_bf16 else 4
    mxu_b = 2 if use_bf16 else 4
    io = 2 * (C * in_b + C * 4 + 4) * lanes              # x, out, attn (x2 buffers)
    temps = (3 * 3 * C * mxu_b + 12 * C * 4) * lanes     # concat buffers + f32 temps/masks
    return io + temps


def _choose_bt(n, l, target_lanes):
    """Samples per grid step: Bt*L is a multiple of 128, bounded by the lane
    target, and the step count is kept >= 2 and preferably EVEN so the
    "parallel" grid axis splits evenly across v7x's two TensorCores."""
    unit = 128 // math.gcd(l, 128)             # smallest Bt with Bt*L % 128 == 0
    n_units = pl.cdiv(n, unit)
    k_lanes = max(1, target_lanes // (unit * l))
    k = min(k_lanes, n_units)
    if n_units >= 2:
        k = min(k, max(1, n_units // 2))       # keep >= 2 steps
        best = k
        for cand in range(k, max(0, k // 2), -1):   # prefer an even step count
            if (-(-n_units // cand)) % 2 == 0:
                best = cand
                break
        k = best
    return unit * max(1, k)


# ---------------------------------------------------------------------------
# Packed-layout entry point (amortize relayout across repeated invocations)
# ---------------------------------------------------------------------------
def ta_block_forward_packed(xl, l, params, *, use_bf16=False, split_taps=False,
                            return_attn=True, target_lanes=8192):
    """xl: (C, N*L) lane-packed activations (each sample = L consecutive lanes).
    Returns lane-packed out (C, N*L) and, if requested, attn (1, N*L)."""
    c, total = xl.shape
    assert c == C, "TA_block is fixed to 16 channels"
    assert total % l == 0
    assert l % 2 == 0, "MaxPool1d(2,2)+interpolate(x2) requires an even length"
    n = total // l

    w1m, b1m, w2, b2, w3, b3, w4, b4 = prepare_kernel_params(params)
    if use_bf16:
        w1m, w2, w3 = (w.astype(jnp.bfloat16) for w in (w1m, w2, w3))
        xl = xl.astype(jnp.bfloat16)           # halve input DMA; accum stays f32

    bt = _choose_bt(n, l, target_lanes)
    n_pad = pl.cdiv(n, bt) * bt
    steps = n_pad // bt
    lanes = bt * l

    ws = _working_set_bytes(lanes, use_bf16)
    if ws > _VMEM_CAP_BYTES:
        # TODO(synk): add a second grid axis over L (with a +-2 lane halo) for
        # very long sequences instead of erroring out.
        raise ValueError(
            f"TA_block per-step working set ~{ws >> 20} MiB exceeds the "
            f"{_VMEM_CAP_BYTES >> 20} MiB VMEM budget (lanes={lanes}, L={l}); "
            "reduce target_lanes or shorten the sequence.")
    vmem_limit = int(min(_VMEM_CAP_BYTES, max(16 << 20, 2 * ws)))

    if n_pad != n:
        xl = jnp.pad(xl, ((0, 0), (0, (n_pad - n) * l)))

    wspec1m = pl.BlockSpec((2 * c, 3 * c), lambda i: (0, 0))
    bspec1m = pl.BlockSpec((2 * c, 1), lambda i: (0, 0))
    wspec = pl.BlockSpec((c, 3 * c), lambda i: (0, 0))
    bspec = pl.BlockSpec((c, 1), lambda i: (0, 0))
    w4spec = pl.BlockSpec((c, 1), lambda i: (0, 0))
    b4spec = pl.BlockSpec((1, 1), lambda i: (0, 0))
    xspec = pl.BlockSpec((c, lanes), lambda i: (0, i))
    aspec = pl.BlockSpec((1, lanes), lambda i: (0, i))

    total_lanes = n_pad * l
    in_bytes = (2 if use_bf16 else 4) * c * total_lanes
    out_bytes = 4 * c * total_lanes + (4 * total_lanes if return_attn else 0)
    cost = pl.CostEstimate(
        flops=int(24 * c * c * total_lanes        # 3 stacked conv matmuls
                  + 2 * c * total_lanes           # attention reduce
                  + 30 * c * total_lanes),        # elementwise (leaky/max/scale)
        transcendentals=int(total_lanes),         # sigmoid
        bytes_accessed=int(in_bytes + out_bytes))

    if return_attn:
        out_shape = (jax.ShapeDtypeStruct((c, total_lanes), jnp.float32),
                     jax.ShapeDtypeStruct((1, total_lanes), jnp.float32))
        out_specs = [xspec, aspec]
    else:
        out_shape = jax.ShapeDtypeStruct((c, total_lanes), jnp.float32)
        out_specs = xspec

    result = pl.pallas_call(
        functools.partial(ta_block_kernel, l_per_sample=l, use_bf16=use_bf16,
                          split_taps=split_taps),
        out_shape=out_shape,
        grid_spec=pltpu.PrefetchScalarGridSpec(
            num_scalar_prefetch=0,
            grid=(steps,),
            in_specs=[wspec1m, bspec1m, wspec, bspec, wspec, bspec,
                      w4spec, b4spec, xspec],
            out_specs=out_specs),
        compiler_params=pltpu.CompilerParams(
            dimension_semantics=("parallel",),
            vmem_limit_bytes=vmem_limit),
        cost_estimate=cost,
    )(w1m, b1m, w2, b2, w3, b3, w4, b4, xl)

    if return_attn:
        out_l, attn_l = result
        return out_l[:, :n * l], attn_l[:, :n * l]
    return result[:, :n * l]


# ---------------------------------------------------------------------------
# (N, C, L) wrapper
# ---------------------------------------------------------------------------
def ta_block_forward(x, params, *, use_bf16=False, split_taps=False,
                     return_attn=True, target_lanes=8192):
    n, c, l = x.shape
    assert c == C, "TA_block is fixed to 16 channels"

    # lane-dense layout: (N, C, L) -> (C, N*L); each sample is L lanes.
    # For repeated TA_block invocations, keep this layout across blocks and
    # call ta_block_forward_packed directly (amortizes the relayout).
    xl = jnp.transpose(x, (1, 0, 2)).reshape(c, n * l)

    res = ta_block_forward_packed(xl, l, params, use_bf16=use_bf16,
                                  split_taps=split_taps,
                                  return_attn=return_attn,
                                  target_lanes=target_lanes)
    if return_attn:
        out_l, attn_l = res
        out = out_l.reshape(c, n, l).transpose(1, 0, 2)
        attn = attn_l.reshape(1, n, l).transpose(1, 0, 2)
        return out, attn
    return res.reshape(c, n, l).transpose(1, 0, 2)


# ---------------------------------------------------------------------------
# Parameter preparation (BN folded, taps stacked along the contraction)
# ---------------------------------------------------------------------------
def prepare_kernel_params(params):
    (w1, b1), (w2, b2), (w3, b3), (w4, b4), (wm, bm) = params

    def mat(w):  # (Co, Ci, 3) -> (Co, 3*Ci), columns ordered [tap0 | tap1 | tap2]
        co, ci, k = w.shape
        return jnp.transpose(w, (0, 2, 1)).reshape(co, k * ci)

    w1m = jnp.concatenate([mat(w1), mat(wm)], axis=0)   # (2C, 3C) fused conv_a_1+conv_m
    b1m = jnp.concatenate([b1, bm], axis=0)[:, None]    # (2C, 1)
    return (w1m, b1m,
            mat(w2), b2[:, None],
            mat(w3), b3[:, None],
            w4[0, :, 0][:, None],                       # (C, 1)
            b4[:, None])                                # (1, 1)


def _fold_bn(w, b, gamma, beta, mean, var, eps=1e-5):
    scale = gamma / jnp.sqrt(var + eps)
    return w * scale[:, None, None], (b - mean) * scale + beta


def init_params(key):
    keys = iter(jax.random.split(key, 32))

    def conv_init(co, ci, kw):
        bound = 1.0 / math.sqrt(ci * kw)
        w = jax.random.uniform(next(keys), (co, ci, kw), jnp.float32, -bound, bound)
        b = jax.random.uniform(next(keys), (co,), jnp.float32, -bound, bound)
        return w, b

    def bn_init(ch):
        gamma = 1.0 + 0.1 * jax.random.normal(next(keys), (ch,), jnp.float32)
        beta = 0.1 * jax.random.normal(next(keys), (ch,), jnp.float32)
        mean = 0.1 * jax.random.normal(next(keys), (ch,), jnp.float32)
        var = 1.0 + 0.1 * jnp.abs(jax.random.normal(next(keys), (ch,), jnp.float32))
        return gamma, beta, mean, var

    def folded(co=C, ci=C, kw=3):
        w, b = conv_init(co, ci, kw)
        return _fold_bn(w, b, *bn_init(co))

    conv_a_1 = folded()
    conv_a_2 = folded()
    conv_a_3 = folded()
    conv_a_4 = conv_init(1, C, 1)   # no BN
    conv_m = folded()
    return (conv_a_1, conv_a_2, conv_a_3, conv_a_4, conv_m)


# ---------------------------------------------------------------------------
# Pure-JAX reference (explicit pool / interpolate) for verification
# ---------------------------------------------------------------------------
def reference_forward(x, params):
    (w1, b1), (w2, b2), (w3, b3), (w4, b4), (wm, bm) = params

    def conv3(h, w, b):
        hp = jnp.pad(h, ((0, 0), (0, 0), (1, 1)))
        ll = h.shape[-1]
        y = sum(jnp.einsum('oc,ncl->nol', w[:, :, k], hp[:, :, k:k + ll])
                for k in range(3))
        return y + b[None, :, None]

    leaky = lambda v: jnp.where(v > 0, v, NEG_SLOPE * v)

    x1 = leaky(conv3(x, w1, b1))
    n, c, l = x1.shape
    d = jnp.max(x1.reshape(n, c, l // 2, 2), axis=-1)           # MaxPool1d(2,2)
    e = leaky(conv3(d, w2, b2))
    u = jnp.repeat(e, 2, axis=-1)                               # nearest upsample x2
    x_up = leaky(conv3(u, w3, b3))
    x2 = x1 + x_up
    attn = jax.nn.sigmoid(jnp.einsum('oc,ncl->nol', w4[:, :, 0], x2)
                          + b4[None, :, None])
    xm = leaky(conv3(x, wm, bm))
    return xm * attn + x, attn


# ---------------------------------------------------------------------------
if __name__ == "__main__":
    key = jax.random.PRNGKey(0)
    pkey, xkey, xkey2 = jax.random.split(key, 3)
    params = init_params(pkey)

    # X : (N=2, C=16, L=16)  — Conv1d(16, ...) implies 16 input channels.
    x = jax.random.normal(xkey, (2, 16, 16), jnp.float32)
    out, attn = jax.block_until_ready(ta_block_forward(x, params))
    ref_out, ref_attn = reference_forward(x, params)
    assert out.shape == (2, 16, 16) and attn.shape == (2, 1, 16)
    assert jnp.allclose(out, ref_out, atol=1e-4, rtol=1e-4)
    assert jnp.allclose(attn, ref_attn, atol=1e-4, rtol=1e-4)

    # multi-step grid + batch padding + step-count balancing path
    xb = jax.random.normal(xkey2, (20, 16, 96), jnp.float32)
    out_b, attn_b = jax.block_until_ready(ta_block_forward(xb, params))
    ref_out_b, ref_attn_b = reference_forward(xb, params)
    assert jnp.allclose(out_b, ref_out_b, atol=1e-4, rtol=1e-4)
    assert jnp.allclose(attn_b, ref_attn_b, atol=1e-4, rtol=1e-4)

    # v5e split-tap conv variant + attention output elided
    out_s = jax.block_until_ready(
        ta_block_forward(x, params, split_taps=True, return_attn=False))
    assert jnp.allclose(out_s, ref_out, atol=1e-4, rtol=1e-4)

    # bf16 MXU-staging variant (v6e/v7x lever): f32 accumulation + f32 elementwise.
    out_bf, attn_bf = jax.block_until_ready(
        ta_block_forward(x, params, use_bf16=True))
    assert jnp.allclose(out_bf, ref_out, atol=1e-1, rtol=1e-1)
    assert jnp.allclose(attn_bf, ref_attn, atol=1e-1, rtol=1e-1)

    print("KERNEL_OK")
</pallas_src>

<mosaic_0001>
module attributes {stable_mosaic.version = 11 : i64} {
  func.func @ta_block_kernel(%arg0: i32, %arg1: memref<32x48xf32, #tpu.memory_space<vmem>>, %arg2: memref<32x1xf32, #tpu.memory_space<vmem>>, %arg3: memref<16x48xf32, #tpu.memory_space<vmem>>, %arg4: memref<16x1xf32, #tpu.memory_space<vmem>>, %arg5: memref<16x48xf32, #tpu.memory_space<vmem>>, %arg6: memref<16x1xf32, #tpu.memory_space<vmem>>, %arg7: memref<16x1xf32, #tpu.memory_space<vmem>>, %arg8: memref<1x1xf32, #tpu.memory_space<vmem>>, %arg9: memref<16x128xf32, #tpu.memory_space<vmem>>, %arg10: memref<16x128xf32, #tpu.memory_space<vmem>>, %arg11: memref<1x128xf32, #tpu.memory_space<vmem>>) attributes {dimension_semantics = [#tpu.dimension_semantics<parallel>], iteration_bounds = array<i64: 1>, scalar_prefetch = 0 : i64, scratch_operands = 0 : i64, tpu.core_type = #tpu.core_type<tc>, window_params = [{pipeline_mode = #tpu.pipeline_mode<synchronous>, transform_indices = @transform_0, window_bounds = array<i64: 32, 48>}, {pipeline_mode = #tpu.pipeline_mode<synchronous>, transform_indices = @transform_1, window_bounds = array<i64: 32, 1>}, {pipeline_mode = #tpu.pipeline_mode<synchronous>, transform_indices = @transform_2, window_bounds = array<i64: 16, 48>}, {pipeline_mode = #tpu.pipeline_mode<synchronous>, transform_indices = @transform_3, window_bounds = array<i64: 16, 1>}, {pipeline_mode = #tpu.pipeline_mode<synchronous>, transform_indices = @transform_4, window_bounds = array<i64: 16, 48>}, {pipeline_mode = #tpu.pipeline_mode<synchronous>, transform_indices = @transform_5, window_bounds = array<i64: 16, 1>}, {pipeline_mode = #tpu.pipeline_mode<synchronous>, transform_indices = @transform_6, window_bounds = array<i64: 16, 1>}, {pipeline_mode = #tpu.pipeline_mode<synchronous>, transform_indices = @transform_7, window_bounds = array<i64: 1, 1>}, {transform_indices = @transform_8, window_bounds = array<i64: 16, 128>}, {transform_indices = @transform_9, window_bounds = array<i64: 16, 128>}, {transform_indices = @transform_10, window_bounds = array<i64: 1, 128>}]} {
    %c0 = arith.constant 0 : index
    %c0_0 = arith.constant 0 : index
    %0 = vector.load %arg9[%c0, %c0_0] : memref<16x128xf32, #tpu.memory_space<vmem>>, vector<16x128xf32>
    %1 = tpu.iota {dimensions = array<i32: 1>} : vector<16x128xi32>
    %c15_i32 = arith.constant 15 : i32
    %2 = vector.broadcast %c15_i32 : i32 to vector<16x128xi32>
    %3 = arith.andi %1, %2 : vector<16x128xi32>
    %c1_i32 = arith.constant 1 : i32
    %4 = vector.broadcast %c1_i32 : i32 to vector<16x128xi32>
    %5 = arith.cmpi slt, %3, %4 : vector<16x128xi32>
    %c15_i32_1 = arith.constant 15 : i32
    %6 = vector.broadcast %c15_i32_1 : i32 to vector<16x128xi32>
    %7 = arith.cmpi sge, %3, %6 : vector<16x128xi32>
    %c2_i32 = arith.constant 2 : i32
    %8 = vector.broadcast %c2_i32 : i32 to vector<16x128xi32>
    %9 = arith.cmpi slt, %3, %8 : vector<16x128xi32>
    %c14_i32 = arith.constant 14 : i32
    %10 = vector.broadcast %c14_i32 : i32 to vector<16x128xi32>
    %11 = arith.cmpi sge, %3, %10 : vector<16x128xi32>
    %c1_i32_2 = arith.constant 1 : i32
    %12 = vector.broadcast %c1_i32_2 : i32 to vector<16x128xi32>
    %13 = arith.andi %3, %12 : vector<16x128xi32>
    %c0_i32 = arith.constant 0 : i32
    %14 = vector.broadcast %c0_i32 : i32 to vector<16x128xi32>
    %15 = arith.cmpi eq, %13, %14 : vector<16x128xi32>
    %c1_i32_3 = arith.constant 1 : i32
    %16 = tpu.dynamic_rotate %0 by %c1_i32_3 dim 1 : vector<16x128xf32>, i32 -> vector<16x128xf32>
    %cst = arith.constant 0.000000e+00 : f32
    %17 = vector.broadcast %cst : f32 to vector<16x128xf32>
    %18 = arith.select %5, %17, %16 : vector<16x128xi1>, vector<16x128xf32>
    %c127_i32 = arith.constant 127 : i32
    %19 = tpu.dynamic_rotate %0 by %c127_i32 dim 1 : vector<16x128xf32>, i32 -> vector<16x128xf32>
    %cst_4 = arith.constant 0.000000e+00 : f32
    %20 = vector.broadcast %cst_4 : f32 to vector<16x128xf32>
    %21 = arith.select %7, %20, %19 : vector<16x128xi1>, vector<16x128xf32>
    %c0_5 = arith.constant 0 : index
    %c0_6 = arith.constant 0 : index
    %22 = vector.load %arg1[%c0_5, %c0_6] : memref<32x48xf32, #tpu.memory_space<vmem>>, vector<32x48xf32>
    %23 = tpu.concatenate %18, %0, %21 in 0 : vector<16x128xf32>, vector<16x128xf32>, vector<16x128xf32> -> vector<48x128xf32>
    %cst_7 = arith.constant dense<0.000000e+00> : vector<32x128xf32>
    %24 = tpu.matmul %22, %23, %cst_7 {dimension_numbers = #tpu.dot_dimension_numbers<[1], [0], [0], [1], [0, 0, 1, 1], [], []>} : vector<32x48xf32>, vector<48x128xf32>, vector<32x128xf32> -> vector<32x128xf32>
    %c0_8 = arith.constant 0 : index
    %c0_9 = arith.constant 0 : index
    %25 = vector.load %arg2[%c0_8, %c0_9] : memref<32x1xf32, #tpu.memory_space<vmem>>, vector<32x1xf32>
    %26 = vector.broadcast %25 : vector<32x1xf32> to vector<32x128xf32>
    %27 = arith.addf %24, %26 : vector<32x128xf32>
    %cst_10 = arith.constant 0.000000e+00 : f32
    %28 = vector.broadcast %cst_10 : f32 to vector<32x128xf32>
    %29 = arith.cmpf ogt, %27, %28 : vector<32x128xf32>
    %cst_11 = arith.constant 0.00999999977 : f32
    %30 = vector.broadcast %cst_11 : f32 to vector<32x128xf32>
    %31 = arith.mulf %30, %27 : vector<32x128xf32>
    %32 = arith.select %29, %27, %31 : vector<32x128xi1>, vector<32x128xf32>
    %33 = vector.extract_strided_slice %32 {offsets = [0, 0], sizes = [16, 128], strides = [1, 1]} : vector<32x128xf32> to vector<16x128xf32>
    %34 = vector.extract_strided_slice %32 {offsets = [16, 0], sizes = [16, 128], strides = [1, 1]} : vector<32x128xf32> to vector<16x128xf32>
    %c127_i32_12 = arith.constant 127 : i32
    %35 = tpu.dynamic_rotate %33 by %c127_i32_12 dim 1 : vector<16x128xf32>, i32 -> vector<16x128xf32>
    %cst_13 = arith.constant 0.000000e+00 : f32
    %36 = vector.broadcast %cst_13 : f32 to vector<16x128xf32>
    %37 = arith.select %7, %36, %35 : vector<16x128xi1>, vector<16x128xf32>
    %38 = arith.maximumf %33, %37 : vector<16x128xf32>
    %c1_i32_14 = arith.constant 1 : i32
    %39 = tpu.dynamic_rotate %33 by %c1_i32_14 dim 1 : vector<16x128xf32>, i32 -> vector<16x128xf32>
    %cst_15 = arith.constant 0.000000e+00 : f32
    %40 = vector.broadcast %cst_15 : f32 to vector<16x128xf32>
    %41 = arith.select %5, %40, %39 : vector<16x128xi1>, vector<16x128xf32>
    %42 = arith.maximumf %41, %33 : vector<16x128xf32>
    %43 = arith.select %15, %38, %42 : vector<16x128xi1>, vector<16x128xf32>
    %c2_i32_16 = arith.constant 2 : i32
    %44 = tpu.dynamic_rotate %43 by %c2_i32_16 dim 1 : vector<16x128xf32>, i32 -> vector<16x128xf32>
    %cst_17 = arith.constant 0.000000e+00 : f32
    %45 = vector.broadcast %cst_17 : f32 to vector<16x128xf32>
    %46 = arith.select %9, %45, %44 : vector<16x128xi1>, vector<16x128xf32>
    %c126_i32 = arith.constant 126 : i32
    %47 = tpu.dynamic_rotate %43 by %c126_i32 dim 1 : vector<16x128xf32>, i32 -> vector<16x128xf32>
    %cst_18 = arith.constant 0.000000e+00 : f32
    %48 = vector.broadcast %cst_18 : f32 to vector<16x128xf32>
    %49 = arith.select %11, %48, %47 : vector<16x128xi1>, vector<16x128xf32>
    %c0_19 = arith.constant 0 : index
    %c0_20 = arith.constant 0 : index
    %50 = vector.load %arg3[%c0_19, %c0_20] : memref<16x48xf32, #tpu.memory_space<vmem>>, vector<16x48xf32>
    %51 = tpu.concatenate %46, %43, %49 in 0 : vector<16x128xf32>, vector<16x128xf32>, vector<16x128xf32> -> vector<48x128xf32>
    %cst_21 = arith.constant dense<0.000000e+00> : vector<16x128xf32>
    %52 = tpu.matmul %50, %51, %cst_21 {dimension_numbers = #tpu.dot_dimension_numbers<[1], [0], [0], [1], [0, 0, 1, 1], [], []>} : vector<16x48xf32>, vector<48x128xf32>, vector<16x128xf32> -> vector<16x128xf32>
    %c0_22 = arith.constant 0 : index
    %c0_23 = arith.constant 0 : index
    %53 = vector.load %arg4[%c0_22, %c0_23] : memref<16x1xf32, #tpu.memory_space<vmem>>, vector<16x1xf32>
    %54 = vector.broadcast %53 : vector<16x1xf32> to vector<16x128xf32>
    %55 = arith.addf %52, %54 : vector<16x128xf32>
    %cst_24 = arith.constant 0.000000e+00 : f32
    %56 = vector.broadcast %cst_24 : f32 to vector<16x128xf32>
    %57 = arith.cmpf ogt, %55, %56 : vector<16x128xf32>
    %cst_25 = arith.constant 0.00999999977 : f32
    %58 = vector.broadcast %cst_25 : f32 to vector<16x128xf32>
    %59 = arith.mulf %58, %55 : vector<16x128xf32>
    %60 = arith.select %57, %55, %59 : vector<16x128xi1>, vector<16x128xf32>
    %c1_i32_26 = arith.constant 1 : i32
    %61 = tpu.dynamic_rotate %60 by %c1_i32_26 dim 1 : vector<16x128xf32>, i32 -> vector<16x128xf32>
    %cst_27 = arith.constant 0.000000e+00 : f32
    %62 = vector.broadcast %cst_27 : f32 to vector<16x128xf32>
    %63 = arith.select %5, %62, %61 : vector<16x128xi1>, vector<16x128xf32>
    %c127_i32_28 = arith.constant 127 : i32
    %64 = tpu.dynamic_rotate %60 by %c127_i32_28 dim 1 : vector<16x128xf32>, i32 -> vector<16x128xf32>
    %cst_29 = arith.constant 0.000000e+00 : f32
    %65 = vector.broadcast %cst_29 : f32 to vector<16x128xf32>
    %66 = arith.select %7, %65, %64 : vector<16x128xi1>, vector<16x128xf32>
    %c0_30 = arith.constant 0 : index
    %c0_31 = arith.constant 0 : index
    %67 = vector.load %arg5[%c0_30, %c0_31] : memref<16x48xf32, #tpu.memory_space<vmem>>, vector<16x48xf32>
    %68 = tpu.concatenate %63, %60, %66 in 0 : vector<16x128xf32>, vector<16x128xf32>, vector<16x128xf32> -> vector<48x128xf32>
    %cst_32 = arith.constant dense<0.000000e+00> : vector<16x128xf32>
    %69 = tpu.matmul %67, %68, %cst_32 {dimension_numbers = #tpu.dot_dimension_numbers<[1], [0], [0], [1], [0, 0, 1, 1], [], []>} : vector<16x48xf32>, vector<48x128xf32>, vector<16x128xf32> -> vector<16x128xf32>
    %c0_33 = arith.constant 0 : index
    %c0_34 = arith.constant 0 : index
    %70 = vector.load %arg6[%c0_33, %c0_34] : memref<16x1xf32, #tpu.memory_space<vmem>>, vector<16x1xf32>
    %71 = vector.broadcast %70 : vector<16x1xf32> to vector<16x128xf32>
    %72 = arith.addf %69, %71 : vector<16x128xf32>
    %cst_35 = arith.constant 0.000000e+00 : f32
    %73 = vector.broadcast %cst_35 : f32 to vector<16x128xf32>
    %74 = arith.cmpf ogt, %72, %73 : vector<16x128xf32>
    %cst_36 = arith.constant 0.00999999977 : f32
    %75 = vector.broadcast %cst_36 : f32 to vector<16x128xf32>
    %76 = arith.mulf %75, %72 : vector<16x128xf32>
    %77 = arith.select %74, %72, %76 : vector<16x128xi1>, vector<16x128xf32>
    %78 = arith.addf %33, %77 : vector<16x128xf32>
    %c0_37 = arith.constant 0 : index
    %c0_38 = arith.constant 0 : index
    %79 = vector.load %arg7[%c0_37, %c0_38] : memref<16x1xf32, #tpu.memory_space<vmem>>, vector<16x1xf32>
    %80 = vector.broadcast %79 : vector<16x1xf32> to vector<16x128xf32>
    %81 = arith.mulf %80, %78 : vector<16x128xf32>
    %cst_39 = arith.constant dense<0.000000e+00> : vector<128xf32>
    %82 = vector.multi_reduction <add>, %81, %cst_39 [0] : vector<16x128xf32> to vector<128xf32>
    %83 = vector.shape_cast %82 : vector<128xf32> to vector<1x128xf32>
    %c0_40 = arith.constant 0 : index
    %c0_41 = arith.constant 0 : index
    %84 = vector.load %arg8[%c0_40, %c0_41] : memref<1x1xf32, #tpu.memory_space<vmem>>, vector<1x1xf32>
    %85 = vector.broadcast %84 : vector<1x1xf32> to vector<1x128xf32>
    %86 = arith.addf %83, %85 : vector<1x128xf32>
    %87 = arith.negf %86 : vector<1x128xf32>
    %88 = math.exp %87 : vector<1x128xf32>
    %cst_42 = arith.constant 1.000000e+00 : f32
    %89 = vector.broadcast %cst_42 : f32 to vector<1x128xf32>
    %90 = arith.addf %89, %88 : vector<1x128xf32>
    %91 = arith.divf %89, %90 : vector<1x128xf32>
    %92 = vector.broadcast %91 : vector<1x128xf32> to vector<16x128xf32>
    %93 = arith.mulf %34, %92 : vector<16x128xf32>
    %94 = arith.addf %93, %0 : vector<16x128xf32>
    %c0_43 = arith.constant 0 : index
    %c0_44 = arith.constant 0 : index
    %95 = vector.load %arg10[%c0_43, %c0_44] : memref<16x128xf32, #tpu.memory_space<vmem>>, vector<16x128xf32>
    tpu.vector_store %arg10[%c0_43, %c0_44], %94 {strides = array<i32>} : memref<16x128xf32, #tpu.memory_space<vmem>>, vector<16x128xf32>,
    %c0_45 = arith.constant 0 : index
    %c0_46 = arith.constant 0 : index
    %96 = vector.load %arg11[%c0_45, %c0_46] : memref<1x128xf32, #tpu.memory_space<vmem>>, vector<1x128xf32>
    tpu.vector_store %arg11[%c0_45, %c0_46], %91 {strides = array<i32>} : memref<1x128xf32, #tpu.memory_space<vmem>>, vector<1x128xf32>,
    return
  }
  func.func @transform_0(%arg0: i32) -> (i32, i32) {
    %c0_i32 = arith.constant 0 : i32
    %c0_i32_0 = arith.constant 0 : i32
    %c0_i32_1 = arith.constant 0 : i32
    return %c0_i32, %c0_i32_0 : i32, i32
  }
  func.func @transform_1(%arg0: i32) -> (i32, i32) {
    %c0_i32 = arith.constant 0 : i32
    %c0_i32_0 = arith.constant 0 : i32
    %c0_i32_1 = arith.constant 0 : i32
    return %c0_i32, %c0_i32_0 : i32, i32
  }
  func.func @transform_2(%arg0: i32) -> (i32, i32) {
    %c0_i32 = arith.constant 0 : i32
    %c0_i32_0 = arith.constant 0 : i32
    %c0_i32_1 = arith.constant 0 : i32
    return %c0_i32, %c0_i32_0 : i32, i32
  }
  func.func @transform_3(%arg0: i32) -> (i32, i32) {
    %c0_i32 = arith.constant 0 : i32
    %c0_i32_0 = arith.constant 0 : i32
    %c0_i32_1 = arith.constant 0 : i32
    return %c0_i32, %c0_i32_0 : i32, i32
  }
  func.func @transform_4(%arg0: i32) -> (i32, i32) {
    %c0_i32 = arith.constant 0 : i32
    %c0_i32_0 = arith.constant 0 : i32
    %c0_i32_1 = arith.constant 0 : i32
    return %c0_i32, %c0_i32_0 : i32, i32
  }
  func.func @transform_5(%arg0: i32) -> (i32, i32) {
    %c0_i32 = arith.constant 0 : i32
    %c0_i32_0 = arith.constant 0 : i32
    %c0_i32_1 = arith.constant 0 : i32
    return %c0_i32, %c0_i32_0 : i32, i32
  }
  func.func @transform_6(%arg0: i32) -> (i32, i32) {
    %c0_i32 = arith.constant 0 : i32
    %c0_i32_0 = arith.constant 0 : i32
    %c0_i32_1 = arith.constant 0 : i32
    return %c0_i32, %c0_i32_0 : i32, i32
  }
  func.func @transform_7(%arg0: i32) -> (i32, i32) {
    %c0_i32 = arith.constant 0 : i32
    %c0_i32_0 = arith.constant 0 : i32
    %c0_i32_1 = arith.constant 0 : i32
    return %c0_i32, %c0_i32_0 : i32, i32
  }
  func.func @transform_8(%arg0: i32) -> (i32, i32) {
    %c0_i32 = arith.constant 0 : i32
    %c0_i32_0 = arith.constant 0 : i32
    return %c0_i32, %arg0 : i32, i32
  }
  func.func @transform_9(%arg0: i32) -> (i32, i32) {
    %c0_i32 = arith.constant 0 : i32
    %c0_i32_0 = arith.constant 0 : i32
    return %c0_i32, %arg0 : i32, i32
  }
  func.func @transform_10(%arg0: i32) -> (i32, i32) {
    %c0_i32 = arith.constant 0 : i32
    %c0_i32_0 = arith.constant 0 : i32
    return %c0_i32, %arg0 : i32, i32
  }
}

</mosaic_0001>

<bundles_post_ra>
// kernel: tpu_custom_call.1
= control target key start
LH: loop header
LB: loop body
LE: loop exit
PB: predicated region body
PF: predicated region fallthrough
CT: control target
= control target key end

     0   :  { %s715_s0 = inlined_call_operand.vmem [shape: f32[32,48], index: 0, kind: input, shape index: {}]   ;;  %s716_s1 = inlined_call_operand.vmem [shape: f32[32,1], index: 1, kind: input, shape index: {}]   ;;  %s717_s2 = inlined_call_operand.vmem [shape: f32[16,48], index: 2, kind: input, shape index: {}]   ;;  %s718_s3 = inlined_call_operand.vmem [shape: f32[16,1], index: 3, kind: input, shape index: {}]   ;;  %s719_s4 = inlined_call_operand.vmem [shape: f32[16,48], index: 4, kind: input, shape index: {}]   ;;  %s720_s5 = inlined_call_operand.vmem [shape: f32[16,1], index: 5, kind: input, shape index: {}]   ;;  %s721_s6 = inlined_call_operand.vmem [shape: f32[16,1], index: 6, kind: input, shape index: {}]   ;;  %s722_s7 = inlined_call_operand.<no memory space> [shape: f32[1,1], index: 7, kind: input, shape index: {}]   ;;  %s723_s8 = inlined_call_operand.vmem [shape: f32[16,128], index: 8, kind: input, shape index: {}]   ;;  %s724_s9 = inlined_call_operand.hbm [shape: f32[16,128], index: 9, kind: output, shape index: {0}]   ;;  %s725_s10 = inlined_call_operand.hbm [shape: f32[1,128], index: 10, kind: output, shape index: {1}]  }
   0x1   :  { %v16_v0 = vstv %s722_s7 }
   0x2   :  { %17 = vst [vmem:[#allocation2] sm:$0x1] %v16_v0 }
   0x3   :  { %18 = vsyncpa [#allocation4], 0  ;;  %v553_v1 = vld [vmem:[%s723_s8 + $0x8] sm:$0xff] }
   0x4   :  { %19 = vsyncpa [#allocation6], 0  ;;  %s483_s17 = smov 127   ;;  %s484_s18 = smov 1   ;;  %v562_v2 = vld [vmem:[%s723_s8] sm:$0xff]  ;;  %v40_v3 = vlaneseq  ;;  %v66_v6 = vld [vmem:[%s716_s1 + $0x8] sm:$0xff] }
   0x5   :  { %57 = vrot.lane.b32.xlu0 %v553_v1, %s483_s17  ;;  %51 = vrot.lane.b32.xlu1 %v553_v1, %s484_s18  ;;  %v485_v7 = vmov 0   ;;  %v65_v10 = vld [vmem:[%s716_s1] sm:$0xff]  ;;  %vm89_vm4 = vcmask 392192   ;;  %v62_v16 = vld [vmem:[%s715_s0 + $0x8] sm:$0xff]  ;;  %s486_s27 = smov 126   ;;  %s487_s28 = smov 2  }
   0x6   :  { %v41_v4 = vand.u32 127, %v40_v3  ;;  %424 = vset.pattern.permute.xlu2 %v485_v7  ;;  %425 = vset.pattern.permute.xlu0 %v485_v7  ;;  %v61_v15 = vld [vmem:[%s715_s0] sm:$0xff]  ;;  %v176_v42 = vld [vmem:[%s718_s3 + $0x8] sm:$0xff]  ;;  %v63_v44 = vld [vmem:[%s715_s0 + $0x10] sm:$0xff]  ;;  %s360_s12 = sshll.u32 %s725_s10, 4  ;;  %s489_s13 = smov [#allocation3]   ;;  %s361_s12 = int_to_ptr.hbm [resolvable:$true] %s360_s12 }
   0x7   :  { %76 = vperm.xlu2 %424, %v66_v6   ;;  %426 = vset.pattern.permute.xlu1 %v485_v7  ;;  %v175_v43 = vld [vmem:[%s718_s3] sm:$0xff]  ;;  %v64_v45 = vld [vmem:[%s715_s0 + $0x18] sm:$0xff]  ;;  %v286_v49 = vld [vmem:[%s721_s6 + $0x8] sm:$0xff]  ;;  %s344_s14 = sshll.u32 %s489_s13, 4  ;;  %s346_s19 = sshll.u32 %s724_s9, 4  ;;  %s345_s14 = int_to_ptr.vmem [resolvable:$true] %s344_s14  ;;  %s347_s19 = int_to_ptr.hbm [resolvable:$true] %s346_s19 }
   0x8   :  { %v568_v5 = vand.u32 15, %v41_v4  ;;  %v236_v46 = vld [vmem:[%s720_s5] sm:$0xff]  ;;  %v68_v53 = vld [vmem:[%s716_s1 + $0x18] sm:$0xff]  ;;  %v174_v54 = vld [vmem:[%s717_s2 + $0x8] sm:$0xff]  ;;  %s490_s10 = smov 128   ;;  %s491_s20 = smov 8  }
   0x9   :  { %v173_v51 = vld [vmem:[%s717_s2] sm:$0xff]  ;;  %v67_v4 = vld [vmem:[%s716_s1 + $0x10] sm:$0xff]  ;;  %v235_v8 = vld [vmem:[%s719_s4 + $0x8] sm:$0xff] }
   0xa   :  { %vm44_vm0 = vcmp.ge.s32.totalorder %v568_v5, 15  ;;  %vm43_vm2 = vcmp.lt.s32.totalorder %v568_v5, 1  ;;  %v47_v27 = vand.u32 1, %v568_v5  ;;  %vm407_vm8 = vcmp.lt.s32.totalorder %v568_v5, 14  ;;  %v285_v3 = vld [vmem:[%s721_s6] sm:$0xff] }
   0xb   :  { %vm576_vm1 = vmneg %vm44_vm0  ;;  %vm408_vm9 = vcmp.ge.s32.totalorder %v568_v5, 2  ;;  %v237_v5 = vld [vmem:[%s720_s5 + $0x8] sm:$0xff]  ;;  %v306_v6 = vld [vmem:[#allocation2] sm:$0x1] }
   0xc   :  { %vm596_vm3 = vmneg %vm43_vm2  ;;  %vm48_vm7 = vcmp.eq.s32.totalorder %v47_v27, 0 }
   0xd   :  { %55 = vrot.lane.b32.xlu0 %v562_v2, %s483_s17  ;;  %49 = vrot.lane.b32.xlu1 %v562_v2, %s484_s18 }
   0xf   :  { %71 = vperm.xlu2 %424, %v65_v10  }
  0x61   :  { %v77_v17 = vpop.permute.xlu2 %76 }
  0x69   :  { %v72_v18 = vpop.permute.xlu2 %71 }
  0x77   :  { %v58_v9 = vpop.permute.xlu0 %57  ;;  %v52_v11 = vpop.permute.xlu1 %51 }
  0x78   :  { %375 = vmatpush.msk.msra.mxu0 %vm576_vm1, %v58_v9  ;;  %409 = vmatpush.msk.msra.mxu3 %vm576_vm1, %v58_v9 }
  0x7f   :  { %v56_v12 = vpop.permute.xlu0 %55  ;;  %v50_v14 = vpop.permute.xlu1 %49 }
  0x80   :  { %377 = vmatpush.msk.msra.mxu0 %vm576_vm1, %v56_v12  ;;  %410 = vmatpush.msk.msra.mxu3 %vm576_vm1, %v56_v12 }
  0x82   :  { %114 = vmatpush.msra.mxu0 %v553_v1  ;;  %411 = vmatpush.msra.mxu3 %v553_v1 }
  0x84   :  { %115 = vmatpush.msra.mxu0 %v562_v2  ;;  %412 = vmatpush.msra.mxu3 %v562_v2 }
  0x86   :  { %379 = vmatpush.msk.msra.mxu0 %vm596_vm3, %v52_v11  ;;  %413 = vmatpush.msk.msra.mxu3 %vm596_vm3, %v52_v11  ;;  %v234_v11 = vld [vmem:[%s719_s4] sm:$0xff]  ;;  %s488_s4 = smov [#allocation5]  }
  0x88   :  { %381 = vmatpush.msk.msra.mxu0 %vm596_vm3, %v50_v14  ;;  %414 = vmatpush.msk.msra.mxu3 %vm596_vm3, %v50_v14 }
  0x89   :  { %382 = vmatmul.msk.f32.vlgmr.msra.gmra.mxu0 %vm89_vm4, %v61_v15  ;;  %384 = vmatmul.msk.f32.vlgmr.msra.gmra.mxu3 %vm89_vm4, %v63_v44 }
  0x91   :  { %383 = vmatmul.msk.f32.gmra.mxu0 %vm89_vm4, %v62_v16  ;;  %385 = vmatmul.msk.f32.gmra.mxu3 %vm89_vm4, %v64_v45 }
 0x106   :  { %v119_v19 = vpop.f32.mrf.mxu0 }
 0x107   :  { %v120_v20 = vadd.f32 %v119_v19, %v72_v18 }
 0x109   :  { %vm131_vm5 = vcmp.gt.f32.partialorder %v120_v20, 0.0  ;;  %v135_v21 = vmul.f32 0.01, %v120_v20 }
 0x10b   :  { %v618_v22 = vsel %vm131_vm5, %v120_v20, %v135_v21 }
 0x10c   :  { %143 = vrot.lane.b32.xlu2 %v618_v22, %s483_s17 }
 0x10e   :  { %v122_v23 = vpop.f32.mrf.mxu0 }
 0x10f   :  { %v123_v24 = vadd.f32 %v122_v23, %v77_v17 }
 0x111   :  { %vm132_vm6 = vcmp.gt.f32.partialorder %v123_v24, 0.0  ;;  %v136_v25 = vmul.f32 0.01, %v123_v24 }
 0x113   :  { %v622_v26 = vsel %vm132_vm6, %v123_v24, %v136_v25 }
 0x114   :  { %153 = vrot.lane.b32.xlu1 %v622_v26, %s484_s18  ;;  %145 = vrot.lane.b32.xlu0 %v622_v26, %s483_s17 }
 0x11c   :  { %151 = vrot.lane.b32.xlu0 %v618_v22, %s484_s18 }
 0x166   :  { %v144_v34 = vpop.permute.xlu2 %143 }
 0x167   :  { %v147_v36 = vsel %vm44_vm0, 0.0, %v144_v34 }
 0x168   :  { %v149_v39 = vmax.f32 %v618_v22, %v147_v36 }
 0x186   :  { %v154_v28 = vpop.permute.xlu1 %153  ;;  %v146_v29 = vpop.permute.xlu0 %145 }
 0x187   :  { %v156_v30 = vsel %vm43_vm2, 0.0, %v154_v28  ;;  %v148_v31 = vsel %vm44_vm0, 0.0, %v146_v29 }
 0x188   :  { %v158_v32 = vmax.f32 %v156_v30, %v622_v26  ;;  %v150_v33 = vmax.f32 %v622_v26, %v148_v31 }
 0x18a   :  { %v160_v35 = vsel %vm48_vm7, %v150_v33, %v158_v32 }
 0x18b   :  { %169 = vrot.lane.b32.xlu1 %v160_v35, %s486_s27  ;;  %163 = vrot.lane.b32.xlu0 %v160_v35, %s487_s28 }
 0x18e   :  { %v152_v37 = vpop.permute.xlu0 %151 }
 0x18f   :  { %v155_v38 = vsel %vm43_vm2, 0.0, %v152_v37 }
 0x190   :  { %v157_v40 = vmax.f32 %v155_v38, %v618_v22 }
 0x192   :  { %v159_v41 = vsel %vm48_vm7, %v149_v39, %v157_v40 }
 0x193   :  { %161 = vrot.lane.b32.xlu1 %v159_v41, %s487_s28  ;;  %167 = vrot.lane.b32.xlu2 %v159_v41, %s486_s27 }
 0x194   :  { %179 = vperm.xlu0 %425, %v175_v43  }
 0x19b   :  { %184 = vperm.xlu2 %424, %v176_v42  }
 0x19c   :  { %240 = vperm.xlu0 %425, %v236_v46  }
 0x1a4   :  { %294 = vperm.xlu0 %425, %v286_v49  }
 0x1ac   :  { %86 = vperm.xlu0 %425, %v68_v53  }
 0x1ed   :  { %v168_v48 = vpop.permute.xlu2 %167 }
 0x1f5   :  { %v185_v60 = vpop.permute.xlu2 %184 }
 0x1fd   :  { %v170_v47 = vpop.permute.xlu1 %169  ;;  %v164_v50 = vpop.permute.xlu0 %163 }
 0x1fe   :  { %387 = vmatpush.msk.msra.mxu1 %vm407_vm8, %v170_v47 }
 0x200   :  { %389 = vmatpush.msk.msra.mxu1 %vm407_vm8, %v168_v48 }
 0x202   :  { %205 = vmatpush.msra.mxu1 %v160_v35 }
 0x204   :  { %206 = vmatpush.msra.mxu1 %v159_v41 }
 0x205   :  { %v162_v52 = vpop.permute.xlu1 %161 }
 0x206   :  { %391 = vmatpush.msk.msra.mxu1 %vm408_vm9, %v164_v50  ;;  %v180_v55 = vpop.permute.xlu0 %179 }
 0x208   :  { %393 = vmatpush.msk.msra.mxu1 %vm408_vm9, %v162_v52 }
 0x209   :  { %394 = vmatmul.msk.f32.vlgmr.msra.gmra.mxu1 %vm89_vm4, %v173_v51 }
 0x20e   :  { %v241_v14 = vpop.permute.xlu0 %240 }
 0x211   :  { %395 = vmatmul.msk.f32.gmra.mxu1 %vm89_vm4, %v174_v54 }
 0x216   :  { %v295_v27 = vpop.permute.xlu0 %294 }
 0x21e   :  { %v87_v44 = vpop.permute.xlu0 %86 }
 0x286   :  { %v210_v56 = vpop.f32.mrf.mxu1 }
 0x287   :  { %v211_v57 = vadd.f32 %v210_v56, %v180_v55 }
 0x289   :  { %v218_v58 = vmul.f32 0.01, %v211_v57  ;;  %vm216_vm10 = vcmp.gt.f32.partialorder %v211_v57, 0.0 }
 0x28b   :  { %v220_v59 = vsel %vm216_vm10, %v211_v57, %v218_v58 }
 0x28c   :  { %228 = vrot.lane.b32.xlu2 %v220_v59, %s483_s17 }
 0x28e   :  { %v213_v61 = vpop.f32.mrf.mxu1 }
 0x28f   :  { %v214_v62 = vadd.f32 %v213_v61, %v185_v60 }
 0x291   :  { %v219_v63 = vmul.f32 0.01, %v214_v62  ;;  %vm217_vm11 = vcmp.gt.f32.partialorder %v214_v62, 0.0 }
 0x293   :  { %v221_v0 = vsel %vm217_vm11, %v214_v62, %v219_v63 }
 0x294   :  { %222 = vrot.lane.b32.xlu2 %v220_v59, %s484_s18  ;;  %230 = vrot.lane.b32.xlu1 %v221_v0, %s483_s17 }
 0x29c   :  { %289 = vperm.xlu2 %424, %v285_v3   ;;  %224 = vrot.lane.b32.xlu1 %v221_v0, %s484_s18  ;;  %s358_s18 = sshll.u32 %s488_s4, 4  ;;  %s359_s18 = int_to_ptr.vmem [resolvable:$true] %s358_s18 }
 0x2a4   :  { %81 = vperm.xlu2 %424, %v67_v4   ;;  %245 = vperm.xlu1 %426, %v237_v5  }
 0x2ac   :  { %309 = vperm.xlu1 %426, %v306_v6  }
 0x2e6   :  { %v229_v7 = vpop.permute.xlu2 %228 }
 0x2ee   :  { %v223_v12 = vpop.permute.xlu2 %222 }
 0x2f6   :  { %v290_v28 = vpop.permute.xlu2 %289 }
 0x2fe   :  { %v82_v45 = vpop.permute.xlu2 %81 }
 0x306   :  { %v231_v9 = vpop.permute.xlu1 %230 }
 0x307   :  { %397 = vmatpush.msk.msra.mxu2 %vm576_vm1, %v231_v9 }
 0x309   :  { %399 = vmatpush.msk.msra.mxu2 %vm576_vm1, %v229_v7 }
 0x30b   :  { %266 = vmatpush.msra.mxu2 %v221_v0 }
 0x30d   :  { %267 = vmatpush.msra.mxu2 %v220_v59 }
 0x30e   :  { %v225_v10 = vpop.permute.xlu1 %224 }
 0x30f   :  { %401 = vmatpush.msk.msra.mxu2 %vm596_vm3, %v225_v10 }
 0x311   :  { %403 = vmatpush.msk.msra.mxu2 %vm596_vm3, %v223_v12 }
 0x312   :  { %404 = vmatmul.msk.f32.vlgmr.msra.gmra.mxu2 %vm89_vm4, %v234_v11 }
 0x316   :  { %v246_v18 = vpop.permute.xlu1 %245 }
 0x31a   :  { %405 = vmatmul.msk.f32.gmra.mxu2 %vm89_vm4, %v235_v8 }
 0x31e   :  { %v310_v36 = vpop.permute.xlu1 %309 }
 0x31f   :  { %v312_v38 = vperm.slane %v310_v36, 0 }
 0x395   :  { %v271_v15 = vpop.f32.mrf.mxu2 }
 0x396   :  { %v272_v16 = vadd.f32 %v271_v15, %v241_v14 }
 0x398   :  { %v279_v17 = vmul.f32 0.01, %v272_v16  ;;  %vm277_vm12 = vcmp.gt.f32.partialorder %v272_v16, 0.0 }
 0x39a   :  { %v281_v20 = vsel %vm277_vm12, %v272_v16, %v279_v17 }
 0x39b   :  { %v283_v23 = vadd.f32 %v281_v20, %v618_v22  ;;  %v125_v22 = vpop.f32.mrf.mxu3 }
 0x39c   :  { %v126_v49 = vadd.f32 %v125_v22, %v82_v45 }
 0x39d   :  { %v274_v19 = vpop.f32.mrf.mxu2  ;;  %v297_v29 = vmul.f32 %v290_v28, %v283_v23 }
 0x39e   :  { %v275_v21 = vadd.f32 %v274_v19, %v246_v18  ;;  %v137_v55 = vmul.f32 0.01, %v126_v49  ;;  %vm133_vm0 = vcmp.gt.f32.partialorder %v126_v49, 0.0 }
 0x3a0   :  { %vm278_vm13 = vcmp.gt.f32.partialorder %v275_v21, 0.0  ;;  %v280_v13 = vmul.f32 0.01, %v275_v21  ;;  %v141_v60 = vsel %vm133_vm0, %v126_v49, %v137_v55 }
 0x3a2   :  { %v282_v24 = vsel %vm278_vm13, %v275_v21, %v280_v13 }
 0x3a3   :  { %v284_v25 = vadd.f32 %v282_v24, %v622_v26  ;;  %v128_v26 = vpop.f32.mrf.mxu3 }
 0x3a4   :  { %v129_v48 = vadd.f32 %v128_v26, %v87_v44 }
 0x3a5   :  { %v298_v30 = vmul.f32 %v295_v27, %v284_v25 }
 0x3a6   :  { %v138_v54 = vmul.f32 0.01, %v129_v48  ;;  %vm134_vm15 = vcmp.gt.f32.partialorder %v129_v48, 0.0 }
 0x3a7   :  { %v299_v31 = vadd.f32 %v298_v30, %v297_v29 }
 0x3a8   :  { %v142_v59 = vsel %vm134_vm15, %v129_v48, %v138_v54 }
 0x3a9   :  { %v300_v32 = vrot.slane %v299_v31, 4 }
 0x3ab   :  { %v301_v33 = vadd.f32 %v300_v32, %v299_v31 }
 0x3ad   :  { %v302_v34 = vrot.slane %v301_v33, 2 }
 0x3af   :  { %v303_v35 = vadd.f32 %v302_v34, %v301_v33 }
 0x3b1   :  { %v304_v37 = vrot.slane %v303_v35, 1 }
 0x3b3   :  { %v305_v39 = vadd.f32 %v304_v37, %v303_v35 }
 0x3b5   :  { %v313_v40 = vadd.f32 %v312_v38, %v305_v39 }
 0x3b7   :  { %v406_v41 = vmul.f32 -1.442695, %v313_v40 }
 0x3b9   :  { %427 = vpow2.f32 %v406_v41 }
 0x3bf   :  { %v428_v42 = vpop.eup %427 }
 0x3c0   :  { %v317_v43 = vadd.f32 1.0, %v428_v42 }
 0x3c2   :  { %429 = vrcp.f32 %v317_v43  ;;  %v329_v51 = vand.u32 2147483648, %v317_v43  ;;  %v327_v53 = vand.u32 2147483647, %v317_v43  ;;  %vm323_vm1 = vweird.f32 %v317_v43 }
 0x3c4   :  { %v330_v57 = vor.u32 1.1754944e-38, %v329_v51  ;;  %vm328_vm3 = vcmp.eq.f32.partialorder %v327_v53, 8.507059e+37 }
 0x3c8   :  { %v430_v46 = vpop.eup %429 }
 0x3c9   :  { %v319_v47 = vmul.f32 %v430_v46, %v317_v43  ;;  %vm324_vm14 = vweird.f32 %v430_v46 }
 0x3ca   :  { %vm325_vm2 = vmor %vm323_vm1, %vm324_vm14 }
 0x3cb   :  { %v320_v50 = vsub.f32 1.0, %v319_v47 }
 0x3cd   :  { %v321_v52 = vmul.f32 %v430_v46, %v320_v50 }
 0x3cf   :  { %v322_v56 = vadd.f32 %v430_v46, %v321_v52 }
 0x3d1   :  { %v326_v58 = vsel %vm325_vm2, %v430_v46, %v322_v56 }
 0x3d2   :  { %v331_v61 = vsel %vm328_vm3, %v330_v57, %v326_v58 }
 0x3d3   :  { %v333_v62 = vmul.f32 %v331_v61, %v141_v60  ;;  %v334_v63 = vmul.f32 %v331_v61, %v142_v59  ;;  %339 = vst [vmem:[#allocation5] sm:$0x1] %v331_v61 }
 0x3d4   :  { %363 = dma.vmem_to_hbm [thread:$0]  %s359_s18, 16, %s361_s12, [#allocation6]  }
 0x3d5   :  { %v335_v0 = vadd.f32 %v333_v62, %v562_v2  ;;  %v336_v3 = vadd.f32 %v334_v63, %v553_v1 }
 0x3d7   :  { %337 = vst [vmem:[#allocation3] sm:$0xff] %v335_v0 }
 0x3d8   :  { %338 = vst [vmem:[#allocation3 + $0x8] sm:$0xff] %v336_v3 }
 0x3d9   :  { %352 = dma.vmem_to_hbm [thread:$0]  %s345_s14, 256, %s347_s19, [#allocation4], %s490_s10, %s490_s10, %s491_s20  }
 0x3da   :  { %479 = dma.done.wait [#allocation4], 256  }
 0x3db   :  { %480 = vsyncadd [#allocation4], 4294967040 }
 0x3dc   :  { %481 = dma.done.wait [#allocation6], 16  }
 0x3dd   :  { %482 = vsyncadd [#allocation6], 4294967280 }
 0x3de   :  { %372 = vsyncpa [#allocation4], 1 }
 0x3df   :  { %373 = vsyncpa [#allocation6], 1 }

</bundles_post_ra>
